<compile_context>
chip_gen: v7x
topology: tpu7x:2x2x1
jax: 0.10.0
libtpu: 0.0.40
codegen_flags: <defaults>
</compile_context>

<pallas_src>
import jax
import jax.numpy as jnp
from jax.experimental import pallas as pl
from jax.experimental.pallas import tpu as pltpu


def _round_up(x, m):
    return -(-x // m) * m


def _moe_mlp_kernel(x_ref, w1_ref, b1_ref, w2_ref, b2_ref, we_ref, be_ref,
                    out_ref, h2_acc_ref):
    """Grid = (batch tiles, hidden-K tiles); K is the reduction (last) axis."""
    k = pl.program_id(1)

    @pl.when(k == 0)
    def _init():
        h2_acc_ref[...] = jnp.zeros_like(h2_acc_ref)

    # h1 K-tile: relu(x @ W1[:, k_tile] + b1[k_tile])   (bf16 MXU, f32 accum)
    xb = x_ref[...].astype(jnp.bfloat16)
    h1_k = jnp.dot(xb, w1_ref[...], preferred_element_type=jnp.float32)
    h1_k = jnp.maximum(h1_k + b1_ref[...], 0.0)

    # Partial pre-activation of h2: accumulate h1[:, k_tile] @ W2[k_tile, :].
    h2_acc_ref[...] += jnp.dot(h1_k.astype(jnp.bfloat16), w2_ref[...],
                               preferred_element_type=jnp.float32)

    @pl.when(k == pl.num_programs(1) - 1)
    def _finalize():
        h2 = jnp.maximum(h2_acc_ref[...] + b2_ref[...], 0.0)
        # All expert heads fused into one lane-dense matmul: [tm,H] @ [H,n_pad].
        y = jnp.dot(h2.astype(jnp.bfloat16), we_ref[...],
                    preferred_element_type=jnp.float32) + be_ref[...]
        out_ref[...] = y.astype(out_ref.dtype)


def prepare_moe_mlp_params(w1, b1, w2, b2, we, be, *, param_dtype=jnp.bfloat16):
    """One-time parameter prep (hoisted out of the forward pass).

    w1 : [input_dim, hidden]            (transposed vs torch's [out, in])
    b1 : [hidden]
    w2 : [hidden, hidden]
    b2 : [hidden]
    we : [n_component, hidden, out_dim] (per-expert weights, [in, out])
    be : [n_component, out_dim]
    """
    input_dim, hidden = w1.shape
    n_component, _, out_dim = we.shape
    n_total = n_component * out_dim

    h_pad = max(128, _round_up(hidden, 128))   # lane-align the hidden dim
    n_pad = max(128, _round_up(n_total, 128))  # lane-dense fused expert output

    dh = h_pad - hidden
    dn = n_pad - n_total

    w1p = jnp.pad(w1, ((0, 0), (0, dh))).astype(param_dtype)
    b1p = jnp.pad(jnp.reshape(b1, (1, -1)), ((0, 0), (0, dh))).astype(jnp.float32)
    w2p = jnp.pad(w2, ((0, dh), (0, dh))).astype(param_dtype)
    b2p = jnp.pad(jnp.reshape(b2, (1, -1)), ((0, 0), (0, dh))).astype(jnp.float32)

    # [n, H, O] -> [H, n, O] -> [H, n*O]  (expert blocks concatenated along lanes)
    we_flat = jnp.transpose(we, (1, 0, 2)).reshape(hidden, n_total)
    we_flat = jnp.pad(we_flat, ((0, dh), (0, dn))).astype(param_dtype)
    be_flat = jnp.pad(jnp.reshape(be, (1, n_total)), ((0, 0), (0, dn))).astype(jnp.float32)

    meta = dict(n_component=n_component, out_dim=out_dim, n_total=n_total,
                input_dim=input_dim, hidden=hidden, h_pad=h_pad, n_pad=n_pad)
    return dict(w1=w1p, b1=b1p, w2=w2p, b2=b2p, we=we_flat, be=be_flat, meta=meta)


def moe_mlp_policy_forward(params, x):
    """x: [B, input_dim] -> list of n_component arrays, each [B, out_dim]."""
    meta = params["meta"]
    B, input_dim = x.shape
    assert input_dim == meta["input_dim"]
    h_pad, n_pad = meta["h_pad"], meta["n_pad"]

    w1p, b1p = params["w1"], params["b1"]
    w2p, b2p = params["w2"], params["b2"]
    we_flat, be_flat = params["we"], params["be"]

    # Batch tile (parallel axis; v7x's second TensorCore picks up tiles).
    if B % 256 == 0:
        tm = 256
    elif B % 128 == 0:
        tm = 128
    else:
        tm = B
    # Hidden (reduction) tile, last grid axis.
    if h_pad % 512 == 0:
        tk = 512
    elif h_pad % 256 == 0:
        tk = 256
    else:
        tk = 128
    nb = B // tm
    nk = h_pad // tk

    flops = 2 * B * (input_dim * h_pad + h_pad * h_pad + h_pad * n_pad)
    bytes_accessed = int(
        x.size * x.dtype.itemsize
        + sum(a.size * a.dtype.itemsize
              for a in (w1p, b1p, w2p, b2p, we_flat, be_flat))
        + B * n_pad * x.dtype.itemsize)

    # Per-step footprint: double-buffered inputs/outputs + f32 accumulator.
    block_bytes = (2 * (tm * input_dim * x.dtype.itemsize          # x tile
                        + input_dim * tk * 2 + tk * 4              # W1 tile, b1 tile
                        + tk * h_pad * 2 + h_pad * 4               # W2 tile, b2
                        + h_pad * n_pad * 2 + n_pad * 4            # We, be
                        + tm * n_pad * x.dtype.itemsize)           # out tile
                   + tm * h_pad * 4)                               # h2 accumulator
    vmem_limit = int(min(64 * 1024 * 1024, max(8 * 1024 * 1024, 2 * block_bytes)))

    out = pl.pallas_call(
        _moe_mlp_kernel,
        out_shape=jax.ShapeDtypeStruct((B, n_pad), x.dtype),
        grid=(nb, nk),
        in_specs=[
            pl.BlockSpec((tm, input_dim), lambda b, k: (b, 0)),   # x
            pl.BlockSpec((input_dim, tk), lambda b, k: (0, k)),   # W1 column tile
            pl.BlockSpec((1, tk),         lambda b, k: (0, k)),   # b1 tile
            pl.BlockSpec((tk, h_pad),     lambda b, k: (k, 0)),   # W2 row tile
            pl.BlockSpec((1, h_pad),      lambda b, k: (0, 0)),   # b2
            pl.BlockSpec((h_pad, n_pad),  lambda b, k: (0, 0)),   # fused expert W
            pl.BlockSpec((1, n_pad),      lambda b, k: (0, 0)),   # fused expert b
        ],
        out_specs=pl.BlockSpec((tm, n_pad), lambda b, k: (b, 0)),
        scratch_shapes=[pltpu.VMEM((tm, h_pad), jnp.float32)],
        compiler_params=pltpu.CompilerParams(
            dimension_semantics=("parallel", "arbitrary"),
            vmem_limit_bytes=vmem_limit),
        cost_estimate=pl.CostEstimate(flops=flops, transcendentals=0,
                                      bytes_accessed=bytes_accessed),
    )(x, w1p, b1p, w2p, b2p, we_flat, be_flat)

    out_dim = meta["out_dim"]
    return [out[:, i * out_dim:(i + 1) * out_dim]
            for i in range(meta["n_component"])]


def _reference(x, w1, b1, w2, b2, we, be):
    h1 = jnp.maximum(x @ w1 + b1, 0.0)
    h2 = jnp.maximum(h1 @ w2 + b2, 0.0)
    return [h2 @ we[i] + be[i] for i in range(we.shape[0])]


if __name__ == "__main__":
    # Small shapes consistent with the module's forward.
    n_component = 4
    batch = 8
    input_dim = 32
    hidden_dim = 32
    out_dim = 16

    key = jax.random.PRNGKey(0)
    ks = jax.random.split(key, 7)
    x  = jax.random.normal(ks[0], (batch, input_dim), jnp.float32)
    # torch Linear weights are [out, in]; stored transposed as [in, out] here.
    w1 = jax.random.normal(ks[1], (input_dim, hidden_dim), jnp.float32) * 0.1
    b1 = jax.random.normal(ks[2], (hidden_dim,), jnp.float32) * 0.1
    w2 = jax.random.normal(ks[3], (hidden_dim, hidden_dim), jnp.float32) * 0.1
    b2 = jax.random.normal(ks[4], (hidden_dim,), jnp.float32) * 0.1
    we = jax.random.normal(ks[5], (n_component, hidden_dim, out_dim), jnp.float32) * 0.1
    be = jax.random.normal(ks[6], (n_component, out_dim), jnp.float32) * 0.1

    # One-time parameter prep (hoisted out of the forward).
    params = prepare_moe_mlp_params(w1, b1, w2, b2, we, be)
    params = jax.tree_util.tree_map(jax.block_until_ready, params)

    outs = moe_mlp_policy_forward(params, x)
    outs = [jax.block_until_ready(o) for o in outs]

    refs = _reference(x, w1, b1, w2, b2, we, be)
    for o, r in zip(outs, refs):
        assert o.shape == (batch, out_dim)
        # bf16 operands (f32 accumulation) -> looser tolerance than pure f32.
        assert jnp.allclose(o, r, atol=2e-2, rtol=2e-2), "mismatch vs reference"

    print("KERNEL_OK")
</pallas_src>

<mosaic_0001>
module attributes {stable_mosaic.version = 11 : i64} {
  func.func @_moe_mlp_kernel(%arg0: i32, %arg1: i32, %arg2: memref<8x32xf32, #tpu.memory_space<vmem>>, %arg3: memref<32x128xbf16, #tpu.memory_space<vmem>>, %arg4: memref<1x128xf32, #tpu.memory_space<vmem>>, %arg5: memref<128x128xbf16, #tpu.memory_space<vmem>>, %arg6: memref<1x128xf32, #tpu.memory_space<vmem>>, %arg7: memref<128x128xbf16, #tpu.memory_space<vmem>>, %arg8: memref<1x128xf32, #tpu.memory_space<vmem>>, %arg9: memref<8x128xf32, #tpu.memory_space<vmem>>, %arg10: memref<8x128xf32, #tpu.memory_space<vmem>>) attributes {dimension_semantics = [#tpu.dimension_semantics<parallel>, #tpu.dimension_semantics<arbitrary>], iteration_bounds = array<i64: 1, 1>, scalar_prefetch = 0 : i64, scratch_operands = 1 : i64, tpu.core_type = #tpu.core_type<tc>, window_params = [{transform_indices = @transform_0, window_bounds = array<i64: 8, 32>}, {transform_indices = @transform_1, window_bounds = array<i64: 32, 128>}, {transform_indices = @transform_2, window_bounds = array<i64: 1, 128>}, {transform_indices = @transform_3, window_bounds = array<i64: 128, 128>}, {pipeline_mode = #tpu.pipeline_mode<synchronous>, transform_indices = @transform_4, window_bounds = array<i64: 1, 128>}, {pipeline_mode = #tpu.pipeline_mode<synchronous>, transform_indices = @transform_5, window_bounds = array<i64: 128, 128>}, {pipeline_mode = #tpu.pipeline_mode<synchronous>, transform_indices = @transform_6, window_bounds = array<i64: 1, 128>}, {transform_indices = @transform_7, window_bounds = array<i64: 8, 128>}]} {
    %c0_i32 = arith.constant 0 : i32
    %0 = arith.cmpi eq, %arg1, %c0_i32 : i32
    %1 = arith.extui %0 : i1 to i32
    %c0_i32_0 = arith.constant 0 : i32
    %2 = arith.cmpi ne, %1, %c0_i32_0 : i32
    scf.if %2 {
      %cst_16 = arith.constant 0.000000e+00 : f32
      %21 = vector.broadcast %cst_16 : f32 to vector<8x128xf32>
      %c0_17 = arith.constant 0 : index
      %c0_18 = arith.constant 0 : index
      %22 = vector.load %arg10[%c0_17, %c0_18] : memref<8x128xf32, #tpu.memory_space<vmem>>, vector<8x128xf32>
      tpu.vector_store %arg10[%c0_17, %c0_18], %21 {strides = array<i32>} : memref<8x128xf32, #tpu.memory_space<vmem>>, vector<8x128xf32>,
    } else {
    }
    %c0 = arith.constant 0 : index
    %c0_1 = arith.constant 0 : index
    %3 = vector.load %arg2[%c0, %c0_1] : memref<8x32xf32, #tpu.memory_space<vmem>>, vector<8x32xf32>
    %4 = arith.truncf %3 : vector<8x32xf32> to vector<8x32xbf16>
    %c0_2 = arith.constant 0 : index
    %c0_3 = arith.constant 0 : index
    %5 = vector.load %arg3[%c0_2, %c0_3] : memref<32x128xbf16, #tpu.memory_space<vmem>>, vector<32x128xbf16>
    %cst = arith.constant dense<0.000000e+00> : vector<8x128xf32>
    %6 = tpu.matmul %4, %5, %cst {dimension_numbers = #tpu.dot_dimension_numbers<[1], [0], [0], [1], [0, 0, 1, 1], [], []>} : vector<8x32xbf16>, vector<32x128xbf16>, vector<8x128xf32> -> vector<8x128xf32>
    %c0_4 = arith.constant 0 : index
    %c0_5 = arith.constant 0 : index
    %7 = vector.load %arg4[%c0_4, %c0_5] : memref<1x128xf32, #tpu.memory_space<vmem>>, vector<1x128xf32>
    %8 = vector.broadcast %7 : vector<1x128xf32> to vector<8x128xf32>
    %9 = arith.addf %6, %8 : vector<8x128xf32>
    %cst_6 = arith.constant 0.000000e+00 : f32
    %10 = vector.broadcast %cst_6 : f32 to vector<8x128xf32>
    %11 = arith.maximumf %9, %10 : vector<8x128xf32>
    %c0_7 = arith.constant 0 : index
    %c0_8 = arith.constant 0 : index
    %12 = vector.load %arg10[%c0_7, %c0_8] : memref<8x128xf32, #tpu.memory_space<vmem>>, vector<8x128xf32>
    %13 = arith.truncf %11 : vector<8x128xf32> to vector<8x128xbf16>
    %c0_9 = arith.constant 0 : index
    %c0_10 = arith.constant 0 : index
    %14 = vector.load %arg5[%c0_9, %c0_10] : memref<128x128xbf16, #tpu.memory_space<vmem>>, vector<128x128xbf16>
    %cst_11 = arith.constant dense<0.000000e+00> : vector<8x128xf32>
    %15 = tpu.matmul %13, %14, %cst_11 {dimension_numbers = #tpu.dot_dimension_numbers<[1], [0], [0], [1], [0, 0, 1, 1], [], []>} : vector<8x128xbf16>, vector<128x128xbf16>, vector<8x128xf32> -> vector<8x128xf32>
    %16 = arith.addf %12, %15 : vector<8x128xf32>
    %c0_12 = arith.constant 0 : index
    %c0_13 = arith.constant 0 : index
    %17 = vector.load %arg10[%c0_12, %c0_13] : memref<8x128xf32, #tpu.memory_space<vmem>>, vector<8x128xf32>
    tpu.vector_store %arg10[%c0_12, %c0_13], %16 {strides = array<i32>} : memref<8x128xf32, #tpu.memory_space<vmem>>, vector<8x128xf32>,
    %c0_i32_14 = arith.constant 0 : i32
    %18 = arith.cmpi eq, %arg1, %c0_i32_14 : i32
    %19 = arith.extui %18 : i1 to i32
    %c0_i32_15 = arith.constant 0 : i32
    %20 = arith.cmpi ne, %19, %c0_i32_15 : i32
    scf.if %20 {
      %c0_16 = arith.constant 0 : index
      %c0_17 = arith.constant 0 : index
      %21 = vector.load %arg10[%c0_16, %c0_17] : memref<8x128xf32, #tpu.memory_space<vmem>>, vector<8x128xf32>
      %c0_18 = arith.constant 0 : index
      %c0_19 = arith.constant 0 : index
      %22 = vector.load %arg6[%c0_18, %c0_19] : memref<1x128xf32, #tpu.memory_space<vmem>>, vector<1x128xf32>
      %23 = vector.broadcast %22 : vector<1x128xf32> to vector<8x128xf32>
      %24 = arith.addf %21, %23 : vector<8x128xf32>
      %cst_20 = arith.constant 0.000000e+00 : f32
      %25 = vector.broadcast %cst_20 : f32 to vector<8x128xf32>
      %26 = arith.maximumf %24, %25 : vector<8x128xf32>
      %27 = arith.truncf %26 : vector<8x128xf32> to vector<8x128xbf16>
      %c0_21 = arith.constant 0 : index
      %c0_22 = arith.constant 0 : index
      %28 = vector.load %arg7[%c0_21, %c0_22] : memref<128x128xbf16, #tpu.memory_space<vmem>>, vector<128x128xbf16>
      %cst_23 = arith.constant dense<0.000000e+00> : vector<8x128xf32>
      %29 = tpu.matmul %27, %28, %cst_23 {dimension_numbers = #tpu.dot_dimension_numbers<[1], [0], [0], [1], [0, 0, 1, 1], [], []>} : vector<8x128xbf16>, vector<128x128xbf16>, vector<8x128xf32> -> vector<8x128xf32>
      %c0_24 = arith.constant 0 : index
      %c0_25 = arith.constant 0 : index
      %30 = vector.load %arg8[%c0_24, %c0_25] : memref<1x128xf32, #tpu.memory_space<vmem>>, vector<1x128xf32>
      %31 = vector.broadcast %30 : vector<1x128xf32> to vector<8x128xf32>
      %32 = arith.addf %29, %31 : vector<8x128xf32>
      %c0_26 = arith.constant 0 : index
      %c0_27 = arith.constant 0 : index
      %33 = vector.load %arg9[%c0_26, %c0_27] : memref<8x128xf32, #tpu.memory_space<vmem>>, vector<8x128xf32>
      tpu.vector_store %arg9[%c0_26, %c0_27], %32 {strides = array<i32>} : memref<8x128xf32, #tpu.memory_space<vmem>>, vector<8x128xf32>,
    } else {
    }
    return
  }
  func.func @transform_0(%arg0: i32, %arg1: i32) -> (i32, i32) {
    %c0_i32 = arith.constant 0 : i32
    %c0_i32_0 = arith.constant 0 : i32
    return %arg0, %c0_i32 : i32, i32
  }
  func.func @transform_1(%arg0: i32, %arg1: i32) -> (i32, i32) {
    %c0_i32 = arith.constant 0 : i32
    %c0_i32_0 = arith.constant 0 : i32
    return %c0_i32, %arg1 : i32, i32
  }
  func.func @transform_2(%arg0: i32, %arg1: i32) -> (i32, i32) {
    %c0_i32 = arith.constant 0 : i32
    %c0_i32_0 = arith.constant 0 : i32
    return %c0_i32, %arg1 : i32, i32
  }
  func.func @transform_3(%arg0: i32, %arg1: i32) -> (i32, i32) {
    %c0_i32 = arith.constant 0 : i32
    %c0_i32_0 = arith.constant 0 : i32
    return %arg1, %c0_i32 : i32, i32
  }
  func.func @transform_4(%arg0: i32, %arg1: i32) -> (i32, i32) {
    %c0_i32 = arith.constant 0 : i32
    %c0_i32_0 = arith.constant 0 : i32
    %c0_i32_1 = arith.constant 0 : i32
    return %c0_i32, %c0_i32_0 : i32, i32
  }
  func.func @transform_5(%arg0: i32, %arg1: i32) -> (i32, i32) {
    %c0_i32 = arith.constant 0 : i32
    %c0_i32_0 = arith.constant 0 : i32
    %c0_i32_1 = arith.constant 0 : i32
    return %c0_i32, %c0_i32_0 : i32, i32
  }
  func.func @transform_6(%arg0: i32, %arg1: i32) -> (i32, i32) {
    %c0_i32 = arith.constant 0 : i32
    %c0_i32_0 = arith.constant 0 : i32
    %c0_i32_1 = arith.constant 0 : i32
    return %c0_i32, %c0_i32_0 : i32, i32
  }
  func.func @transform_7(%arg0: i32, %arg1: i32) -> (i32, i32) {
    %c0_i32 = arith.constant 0 : i32
    %c0_i32_0 = arith.constant 0 : i32
    return %arg0, %c0_i32 : i32, i32
  }
}

</mosaic_0001>

<bundles_post_ra>
// kernel: tpu_custom_call.1
= control target key start
LH: loop header
LB: loop body
LE: loop exit
PB: predicated region body
PF: predicated region fallthrough
CT: control target
= control target key end

     0   :  { %12 = vsyncpa [#allocation4], 0  ;;  %s794_s0 = inlined_call_operand.hbm [shape: f32[8,32], index: 0, kind: input, shape index: {}]   ;;  %s795_s1 = inlined_call_operand.hbm [shape: bf16[32,128], index: 1, kind: input, shape index: {}]   ;;  %s796_s2 = inlined_call_operand.vmem [shape: f32[1,128], index: 2, kind: input, shape index: {}]   ;;  %s797_s3 = inlined_call_operand.hbm [shape: bf16[128,128], index: 3, kind: input, shape index: {}]   ;;  %s798_s4 = inlined_call_operand.vmem [shape: f32[1,128], index: 4, kind: input, shape index: {}]   ;;  %s799_s5 = inlined_call_operand.hbm [shape: bf16[128,128], index: 5, kind: input, shape index: {}]   ;;  %s800_s6 = inlined_call_operand.vmem [shape: f32[1,128], index: 6, kind: input, shape index: {}]   ;;  %s801_s7 = inlined_call_operand.hbm [shape: f32[8,128], index: 7, kind: output, shape index: {}]  }
   0x1   :  { %13 = vsyncpa [#allocation7], 0 }
   0x2   :  { %14 = vsyncpa [#allocation10], 0 }
   0x3   :  { %15 = vsyncpa [#allocation5], 0  ;;  %s643_s24 = smov [#allocation6]   ;;  %s525_s28 = scalar_lea.hbm %s795_s1, 256 }
   0x4   :  { %s31_s25 = sshll.u32 %s643_s24, 4  ;;  %p526_p0 = scmp.ne.s32.totalorder %s795_s1, %s525_s28  ;;  %s32_s25 = int_to_ptr.vmem [resolvable:$true] %s31_s25 }
   0x5   :  { %p529_p1 = scmp.lt.u32.totalorder %s525_s28, %s795_s1 }
   0x7   :  { %p531_p2 = pnand %p529_p1, %p526_p0 }
   0x9   :  { %534 = shalt.err (!%p531_p2)
}
   0xa   :  { %s535_s10 = scalar_lea.vmem %s32_s25, 256  ;;  %p540_p4 = scmp.lt.s32.totalorder %s32_s25, %s32_s25 }
   0xb   :  { %p536_p3 = scmp.ne.s32.totalorder %s32_s25, %s535_s10  ;;  %p541_p5 = scmp.lt.s32.totalorder %s535_s10, %s535_s10 }
   0xd   :  { %p542_p6 = por %p541_p5, %p540_p4 }
   0xf   :  { %p543_p7 = pnand %p542_p6, %p536_p3 }
  0x11   :  { %546 = shalt.err (!%p543_p7)
}
  0x12   :  { %s644_s11 = smov 64   ;;  %s645_s12 = smov 4  }
  0x13   :  { %37 = dma.hbm_to_vmem [thread:$0]  %s795_s1, 256, %s32_s25, [#allocation7], %s644_s11, %s644_s11, %s645_s12  }
  0x14   :  { %s646_s15 = smov [#allocation3]   ;;  %s647_s17 = smov [#allocation8]  }
  0x15   :  { %s22_s16 = sshll.u32 %s646_s15, 4  ;;  %s45_s18 = sshll.u32 %s647_s17, 4  ;;  %s23_s16 = int_to_ptr.vmem [resolvable:$true] %s22_s16  ;;  %s46_s18 = int_to_ptr.vmem [resolvable:$true] %s45_s18 }
  0x16   :  { %s547_s21 = scalar_lea.hbm %s794_s0, 128 }
  0x17   :  { %p548_p8 = scmp.ne.s32.totalorder %s794_s0, %s547_s21  ;;  %p551_p9 = scmp.lt.u32.totalorder %s547_s21, %s794_s0 }
  0x19   :  { %p553_p10 = pnand %p551_p9, %p548_p8 }
  0x1b   :  { %556 = shalt.err (!%p553_p10)
}
  0x1c   :  { %s557_s1 = scalar_lea.vmem %s23_s16, 128  ;;  %p562_p12 = scmp.lt.s32.totalorder %s23_s16, %s23_s16 }
  0x1d   :  { %p558_p11 = scmp.ne.s32.totalorder %s23_s16, %s557_s1  ;;  %p563_p13 = scmp.lt.s32.totalorder %s557_s1, %s557_s1 }
  0x1f   :  { %p564_p0 = por %p563_p13, %p562_p12 }
  0x21   :  { %p565_p1 = pnand %p564_p0, %p558_p11 }
  0x23   :  { %568 = shalt.err (!%p565_p1)
}
  0x24   :  { %25 = dma.hbm_to_vmem [thread:$0]  %s794_s0, 128, %s23_s16, [#allocation4]  }
  0x25   :  { %s569_s30 = scalar_lea.hbm %s797_s3, 1024 }
  0x26   :  { %p570_p2 = scmp.ne.s32.totalorder %s797_s3, %s569_s30  ;;  %p573_p3 = scmp.lt.u32.totalorder %s569_s30, %s797_s3 }
  0x28   :  { %p575_p4 = pnand %p573_p3, %p570_p2 }
  0x2a   :  { %578 = shalt.err (!%p575_p4)
}
  0x2b   :  { %s579_s14 = scalar_lea.vmem %s46_s18, 1024  ;;  %p584_p6 = scmp.lt.s32.totalorder %s46_s18, %s46_s18 }
  0x2c   :  { %p580_p5 = scmp.ne.s32.totalorder %s46_s18, %s579_s14  ;;  %p585_p7 = scmp.lt.s32.totalorder %s579_s14, %s579_s14 }
  0x2e   :  { %p586_p8 = por %p585_p7, %p584_p6 }
  0x30   :  { %p587_p9 = pnand %p586_p8, %p580_p5 }
  0x32   :  { %590 = shalt.err (!%p587_p9)
}
  0x33   :  { %51 = dma.hbm_to_vmem [thread:$0]  %s797_s3, 1024, %s46_s18, [#allocation7], %s644_s11, %s644_s11, %s645_s12  }
  0x34   :  { %s648_s16 = smov [#allocation9]   ;;  %s591_s21 = scalar_lea.hbm %s799_s5, 1024 }
  0x35   :  { %s59_s17 = sshll.u32 %s648_s16, 4  ;;  %p592_p10 = scmp.ne.s32.totalorder %s799_s5, %s591_s21  ;;  %s60_s17 = int_to_ptr.vmem [resolvable:$true] %s59_s17 }
  0x36   :  { %p595_p11 = scmp.lt.u32.totalorder %s591_s21, %s799_s5 }
  0x38   :  { %p597_p12 = pnand %p595_p11, %p592_p10 }
  0x3a   :  { %600 = shalt.err (!%p597_p12)
}
  0x3b   :  { %s601_s1 = scalar_lea.vmem %s60_s17, 1024  ;;  %p606_p0 = scmp.lt.s32.totalorder %s60_s17, %s60_s17 }
  0x3c   :  { %p602_p13 = scmp.ne.s32.totalorder %s60_s17, %s601_s1  ;;  %p607_p1 = scmp.lt.s32.totalorder %s601_s1, %s601_s1 }
  0x3e   :  { %p608_p2 = por %p607_p1, %p606_p0 }
  0x40   :  { %p609_p3 = pnand %p608_p2, %p602_p13 }
  0x42   :  { %612 = shalt.err (!%p609_p3)
}
  0x43   :  { %65 = dma.hbm_to_vmem [thread:$0]  %s799_s5, 1024, %s60_s17, [#allocation10], %s644_s11, %s644_s11, %s645_s12  }
  0x44   :  { %635 = dma.done.wait [#allocation4], 128  }
  0x45   :  { %636 = vsyncadd [#allocation4], 4294967168 }
  0x46   :  { %637 = dma.done.wait [#allocation7], 1280  }
  0x47   :  { %638 = vsyncadd [#allocation7], 4294966016 }
  0x48   :  { %639 = dma.done.wait [#allocation10], 1024  }
  0x49   :  { %640 = vsyncadd [#allocation10], 4294966272  ;;  %v649_v0 = vmov 0.0   ;;  %vm650_vm0 = vmmov 0   ;;  %v507_v1 = vld [vmem:[#allocation6] sm:$0xff]   ;;  %v508_v2 = vld [vmem:[#allocation6 + $0x8] sm:$0xff]  }
  0x4a   :  { %450 = vmatprep.subr.bf16.mxu0 %v649_v0  ;;  %454 = vmatprep.mubr.msk.bf16.mxu0 %vm650_vm0, %v649_v0  ;;  %v86_v3 = vld [vmem:[#allocation3] sm:$0xff]  ;;  %v509_v4 = vld [vmem:[#allocation8] sm:$0xff]   ;;  %vm111_vm1 = vcmask 261120   ;;  %v511_v7 = vld [vmem:[#allocation8 + $0x10] sm:$0xff]   ;;  %s651_s28 = smov [#allocation11]  }
  0x4b   :  { %458 = vmatprep.subr.bf16.mxu1 %v649_v0  ;;  %474 = vmatprep.mubr.msk.bf16.mxu1 %vm650_vm0, %v649_v0  ;;  %v87_v5 = vpack.c.bf16 %v86_v3, %v86_v3  ;;  %v510_v6 = vld [vmem:[#allocation8 + $0x8] sm:$0xff]   ;;  %v512_v8 = vld [vmem:[#allocation8 + $0x18] sm:$0xff]   ;;  %v513_v9 = vld [vmem:[#allocation8 + $0x20] sm:$0xff]   ;;  %s396_s29 = sshll.u32 %s651_s28, 4  ;;  %s397_s29 = int_to_ptr.vmem [resolvable:$true] %s396_s29 }
  0x4c   :  { %451 = vmatpush3.bf16.msra.mxu0 %v507_v1  ;;  %459 = vmatpush3.bf16.msra.mxu1 %v509_v4  ;;  %v514_v10 = vld [vmem:[#allocation8 + $0x28] sm:$0xff]   ;;  %v515_v11 = vld [vmem:[#allocation8 + $0x30] sm:$0xff]   ;;  %v516_v12 = vld [vmem:[#allocation8 + $0x38] sm:$0xff]   ;;  %p618_p5 = scmp.lt.s32.totalorder %s397_s29, %s397_s29 }
  0x4d   :  { %452 = vmatprep.subr.bf16.mxu0 %v649_v0  ;;  %460 = vmatprep.subr.bf16.mxu1 %v649_v0  ;;  %v517_v13 = vld [vmem:[#allocation9] sm:$0xff]   ;;  %v518_v14 = vld [vmem:[#allocation9 + $0x8] sm:$0xff]   ;;  %v519_v15 = vld [vmem:[#allocation9 + $0x10] sm:$0xff]  }
  0x4e   :  { %v520_v16 = vld [vmem:[#allocation9 + $0x18] sm:$0xff]   ;;  %v521_v17 = vld [vmem:[#allocation9 + $0x20] sm:$0xff]   ;;  %v522_v18 = vld [vmem:[#allocation9 + $0x28] sm:$0xff]  }
  0x4f   :  { %v407_v19 = vld [vmem:[%s796_s2] ss:$0 sm:$0xff]  ;;  %v523_v27 = vld [vmem:[#allocation9 + $0x30] sm:$0xff]   ;;  %v524_v28 = vld [vmem:[#allocation9 + $0x38] sm:$0xff]  }
  0x50   :  { %453 = vmatpush3.bf16.msra.mxu0 %v508_v2  ;;  %461 = vmatpush3.bf16.msra.mxu1 %v510_v6  ;;  %v419_v29 = vld [vmem:[%s798_s4] ss:$0 sm:$0xff]  ;;  %s613_s4 = scalar_lea.vmem %s397_s29, 128 }
  0x51   :  { %478 = vmatprep.subr.bf16.mxu0 %v649_v0  ;;  %462 = vmatprep.subr.bf16.mxu1 %v649_v0  ;;  %v420_v37 = vld [vmem:[%s800_s6] ss:$0 sm:$0xff]  ;;  %p614_p4 = scmp.ne.s32.totalorder %s397_s29, %s613_s4  ;;  %p619_p6 = scmp.lt.s32.totalorder %s613_s4, %s613_s4 }
  0x53   :  { %455 = vmatmul.mubr.msk.bf16.vlgmr.msra.gmra.mrb[0].mxu0 %vm111_vm1, %v87_v5  ;;  %p620_p7 = por %p619_p6, %p618_p5 }
  0x54   :  { %494 = vmatprep.mubr.msk.bf16.mxu0 %vm650_vm0, %v649_v0  ;;  %463 = vmatpush3.bf16.msra.mxu1 %v511_v7 }
  0x55   :  { %464 = vmatprep.subr.bf16.mxu1 %v649_v0  ;;  %479 = vmatpush3.bf16.msra.mxu0 %v517_v13  ;;  %p621_p8 = pnand %p620_p7, %p614_p4 }
  0x56   :  { %480 = vmatprep.subr.bf16.mxu0 %v649_v0 }
  0x58   :  { %465 = vmatpush3.bf16.msra.mxu1 %v512_v8 }
  0x59   :  { %466 = vmatprep.subr.bf16.mxu1 %v649_v0  ;;  %481 = vmatpush3.bf16.msra.mxu0 %v518_v14 }
  0x5a   :  { %482 = vmatprep.subr.bf16.mxu0 %v649_v0 }
  0x5c   :  { %467 = vmatpush3.bf16.msra.mxu1 %v513_v9 }
  0x5d   :  { %468 = vmatprep.subr.bf16.mxu1 %v649_v0  ;;  %483 = vmatpush3.bf16.msra.mxu0 %v519_v15 }
  0x5e   :  { %484 = vmatprep.subr.bf16.mxu0 %v649_v0 }
  0x60   :  { %469 = vmatpush3.bf16.msra.mxu1 %v514_v10 }
  0x61   :  { %470 = vmatprep.subr.bf16.mxu1 %v649_v0  ;;  %485 = vmatpush3.bf16.msra.mxu0 %v520_v16 }
  0x62   :  { %486 = vmatprep.subr.bf16.mxu0 %v649_v0 }
  0x64   :  { %471 = vmatpush3.bf16.msra.mxu1 %v515_v11 }
  0x65   :  { %472 = vmatprep.subr.bf16.mxu1 %v649_v0  ;;  %487 = vmatpush3.bf16.msra.mxu0 %v521_v17 }
  0x66   :  { %488 = vmatprep.subr.bf16.mxu0 %v649_v0 }
  0x68   :  { %473 = vmatpush3.bf16.msra.mxu1 %v516_v12 }
  0x69   :  { %489 = vmatpush3.bf16.msra.mxu0 %v522_v18 }
  0x6a   :  { %490 = vmatprep.subr.bf16.mxu0 %v649_v0 }
  0x6d   :  { %491 = vmatpush3.bf16.msra.mxu0 %v523_v27 }
  0x6e   :  { %492 = vmatprep.subr.bf16.mxu0 %v649_v0 }
  0x71   :  { %493 = vmatpush3.bf16.msra.mxu0 %v524_v28 }
 0x126   :  { %v149_v20 = vpop.f32.mrb[0].mxu0 }
 0x127   :  { %v150_v21 = vadd.f32 %v407_v19, %v149_v20  ;;  %v456_v22 = vpop.f32.mrb[1].mxu0 }
 0x128   :  { %v152_v23 = vpop.f32.mrb[2].mxu0 }
 0x129   :  { %v155_v24 = vmax.f32 %v150_v21, 0.0  ;;  %v457_v25 = vpop.f32.mrb[3].mxu0 }
 0x12b   :  { %v157_v26 = vpack.c.bf16 %v155_v24, %v155_v24 }
 0x12d   :  { %475 = vmatmul.mubr.bf16.vlgmr.msra.gmra.mrb[0].mxu1 %v157_v26 }
 0x200   :  { %v256_v30 = vpop.f32.mrb[0].mxu1 }
 0x201   :  { %v275_v31 = vadd.f32 %v419_v29, %v256_v30  ;;  %v476_v32 = vpop.f32.mrb[1].mxu1 }
 0x202   :  { %v259_v33 = vpop.f32.mrb[2].mxu1 }
 0x203   :  { %v276_v34 = vmax.f32 %v275_v31, 0.0  ;;  %v477_v35 = vpop.f32.mrb[3].mxu1 }
 0x205   :  { %v277_v36 = vpack.c.bf16 %v276_v34, %v276_v34 }
 0x207   :  { %495 = vmatmul.mubr.bf16.vlgmr.msra.gmra.mrb[4].mxu0 %v277_v36 }
 0x2da   :  { %v383_v38 = vpop.f32.mrb[4].mxu0 }
 0x2db   :  { %v384_v39 = vadd.f32 %v420_v37, %v383_v38  ;;  %v496_v40 = vpop.f32.mrb[5].mxu0 }
 0x2dc   :  { %v386_v41 = vpop.f32.mrb[6].mxu0 }
 0x2dd   :  { %389 = vst [vmem:[#allocation11] sm:$0xff] %v384_v39  ;;  %v497_v42 = vpop.f32.mrb[7].mxu0 }
 0x2de   :  { %624 = shalt.err (!%p621_p8)
}
 0x2df   :  { %s625_s6 = scalar_lea.hbm %s801_s7, 128 }
 0x2e0   :  { %p626_p9 = scmp.ne.s32.totalorder %s801_s7, %s625_s6  ;;  %p629_p10 = scmp.lt.u32.totalorder %s625_s6, %s801_s7 }
 0x2e2   :  { %p631_p11 = pnand %p629_p10, %p626_p9 }
 0x2e4   :  { %634 = shalt.err (!%p631_p11)
}
 0x2e5   :  { %399 = dma.vmem_to_hbm [thread:$0]  %s397_s29, 128, %s801_s7, [#allocation5]  }
 0x2e6   :  { %641 = dma.done.wait [#allocation5], 128  }
 0x2e7   :  { %642 = vsyncadd [#allocation5], 4294967168 }
 0x2e8   :  { %403 = vsyncpa [#allocation4], 1 }
 0x2e9   :  { %404 = vsyncpa [#allocation7], 1 }
 0x2ea   :  { %405 = vsyncpa [#allocation10], 1 }
 0x2eb   :  { %406 = vsyncpa [#allocation5], 1 }

</bundles_post_ra>
